<compile_context>
chip_gen: v7x
topology: tpu7x:2x2x1
jax: 0.10.0
libtpu: 0.0.40
codegen_flags: <defaults>
</compile_context>

<pallas_src>
import jax
import jax.numpy as jnp
from jax.experimental import pallas as pl
from jax.experimental.pallas import tpu as pltpu


# --------------------------------------------------------------------------
# Tiling helper
# --------------------------------------------------------------------------
def _pick_tile(total, budget, quantum):
    """Pick a tile size for one dimension.

    Returns (tile, ragged).  `tile` is either the full dimension (if it fits
    the budget) or a multiple of `quantum`, preferring an exact divisor of
    `total`; `ragged` is True iff the last tile is partial."""
    total = int(total)
    budget = int(budget)
    if total <= budget:
        return total, False
    max_q = max(quantum, (budget // quantum) * quantum)
    t = max_q
    while t >= quantum:
        if total % t == 0:
            return t, False
        t -= quantum
    return max_q, True


# --------------------------------------------------------------------------
# Kernels
# --------------------------------------------------------------------------
def _make_fused_kernel(*, eps, n):
    """Single-call path: whole (B, C, HW) tensor resident in VMEM."""
    inv_n = 1.0 / float(n)

    def kernel(x_ref, gamma_ref, beta_ref, o_ref):
        x = x_ref[...].astype(jnp.float32)                  # (B, C, HW)
        s = jnp.sum(x, axis=2, keepdims=True)               # (B, C, 1) lane reduce
        mean = jnp.sum(s, axis=0, keepdims=True) * inv_n    # (1, C, 1)
        d = x - mean
        sq = jnp.sum(d * d, axis=2, keepdims=True)
        var = jnp.sum(sq, axis=0, keepdims=True) * inv_n
        # Reference precedence quirk: shift = mean / sqrt(var + eps).
        shift = mean * jax.lax.rsqrt(var + eps)
        o_ref[...] = (gamma_ref[...] * (x - shift) + beta_ref[...]).astype(o_ref.dtype)

    return kernel


def _make_stats_kernel(*, hw, hw_tile, hw_tiles, ragged_hw):
    """Pass 1: accumulate per-channel sum / sum-of-squares of (x - c0)."""

    def kernel(x_ref, c0_ref, psum_ref, psq_ref):
        b = pl.program_id(2)          # batch        (reduction axis)
        h = pl.program_id(3)          # spatial tile (reduction axis)

        @pl.when((b == 0) & (h == 0))
        def _init():
            psum_ref[...] = jnp.zeros_like(psum_ref)
            psq_ref[...] = jnp.zeros_like(psq_ref)

        def _accum(mask_lanes):
            y = x_ref[...].astype(jnp.float32) - c0_ref[...]   # (C_tile, HW_tile)
            if mask_lanes:
                lane = jax.lax.broadcasted_iota(jnp.int32, y.shape, 1)
                y = jnp.where(h * hw_tile + lane < hw, y, 0.0)
            psum_ref[...] += jnp.sum(y, axis=1, keepdims=True)
            psq_ref[...] += jnp.sum(y * y, axis=1, keepdims=True)

        if ragged_hw:
            # Only the final spatial tile pays for the lane mask.
            @pl.when(h < hw_tiles - 1)
            def _full():
                _accum(False)

            @pl.when(h == hw_tiles - 1)
            def _last():
                _accum(True)
        else:
            _accum(False)

    return kernel


def _norm_kernel(x_ref, gamma_ref, bias_ref, o_ref):
    """Pass 2: out = gamma * x + bias (per-channel FMA, HBM-roofline pass)."""
    x = x_ref[...].astype(jnp.float32)                       # (C_tile, HW_tile)
    o_ref[...] = (gamma_ref[...] * x + bias_ref[...]).astype(o_ref.dtype)


# --------------------------------------------------------------------------
# Wrapper
# --------------------------------------------------------------------------
def batchnorm_pallas(x, gamma=None, beta=None, eps=1e-5, affine=True, *,
                     force_two_pass=False,
                     fused_bytes_limit=4 << 20,     # f32-equivalent bytes of x
                     p1_block_elems=1 << 20,        # ~4 MiB f32 per grid step
                     p2_block_elems=1 << 20):
    """x: (B, C, *spatial); gamma/beta: (C,). Matches the PyTorch module."""
    orig_shape = x.shape
    B, C = int(x.shape[0]), int(x.shape[1])
    HW = 1
    for d in x.shape[2:]:
        HW *= int(d)
    x3 = x.reshape(B, C, HW)                 # free reshape, no transpose
    N = B * HW
    itemsize = x.dtype.itemsize

    if affine:
        g = gamma.astype(jnp.float32)
        bta = beta.astype(jnp.float32)
    else:
        g = jnp.ones((C,), jnp.float32)
        bta = jnp.zeros((C,), jnp.float32)

    total_f32_bytes = B * C * HW * 4

    # ---------------- fused single-call path (tensor fits in VMEM) ----------------
    if (not force_two_pass) and total_f32_bytes <= fused_bytes_limit:
        vmem = min(int(6 * total_f32_bytes) + (8 << 20), 48 << 20)
        out3 = pl.pallas_call(
            _make_fused_kernel(eps=eps, n=N),
            out_shape=jax.ShapeDtypeStruct((B, C, HW), x.dtype),
            grid_spec=pltpu.PrefetchScalarGridSpec(
                num_scalar_prefetch=0,
                grid=(1,),
                in_specs=[
                    pl.BlockSpec((B, C, HW), lambda i: (0, 0, 0)),
                    pl.BlockSpec((1, C, 1), lambda i: (0, 0, 0)),
                    pl.BlockSpec((1, C, 1), lambda i: (0, 0, 0)),
                ],
                out_specs=pl.BlockSpec((B, C, HW), lambda i: (0, 0, 0)),
            ),
            compiler_params=pltpu.CompilerParams(
                dimension_semantics=("arbitrary",),
                vmem_limit_bytes=vmem),
            cost_estimate=pl.CostEstimate(
                flops=8 * B * C * HW, transcendentals=C,
                bytes_accessed=2 * B * C * HW * itemsize),
        )(x3, g.reshape(1, C, 1), bta.reshape(1, C, 1))
        return out3.reshape(orig_shape)

    # ---------------------------- two-pass path ----------------------------
    # Channel tile: full C if it fits on <=128 sublanes, else a multiple-of-8
    # divisor of C (no padded channel tile).  The ragged fallback is correct
    # because per-channel rows are independent and OOB writebacks are dropped.
    C_tile, _ragged_c = _pick_tile(C, 128, 8)
    c_tiles = pl.cdiv(C, C_tile)

    def hw_tiling(block_elems):
        budget = max(128, (int(block_elems) // C_tile) // 128 * 128)
        tile, ragged = _pick_tile(HW, budget, 128)
        return tile, pl.cdiv(HW, tile), ragged

    HW_t1, hw_tiles1, ragged1 = hw_tiling(p1_block_elems)
    HW_t2, hw_tiles2, ragged2 = hw_tiling(p2_block_elems)
    del ragged2  # pass-2 padding is handled by dropped OOB writebacks

    # Per-channel pre-shift (first element of each channel): tiny strided read,
    # removes catastrophic cancellation in E[y^2] - E[y]^2 for offset data.
    c0 = x3[0, :, 0:1].astype(jnp.float32)                    # (C, 1)

    # v7x megacore: give pass 1 a second parallel block even when C <= 128.
    b_split = 2 if (c_tiles == 1 and B >= 2 and B % 2 == 0) else 1
    b_per = B // b_split

    # --- pass 1: per-channel partial sums / sums of squares ---
    x_block_bytes1 = C_tile * HW_t1 * itemsize
    vmem1 = int(2 * x_block_bytes1 + 8 * C_tile * HW_t1) + (8 << 20)
    psum, psq = pl.pallas_call(
        _make_stats_kernel(hw=HW, hw_tile=HW_t1, hw_tiles=hw_tiles1,
                           ragged_hw=ragged1),
        out_shape=(jax.ShapeDtypeStruct((b_split, C, 1), jnp.float32),
                   jax.ShapeDtypeStruct((b_split, C, 1), jnp.float32)),
        grid_spec=pltpu.PrefetchScalarGridSpec(
            num_scalar_prefetch=0,
            grid=(b_split, c_tiles, b_per, hw_tiles1),   # reduction axes last
            in_specs=[
                pl.BlockSpec((None, C_tile, HW_t1),
                             lambda s, c, b, h: (s * b_per + b, c, h)),
                pl.BlockSpec((C_tile, 1), lambda s, c, b, h: (c, 0)),
            ],
            out_specs=[
                pl.BlockSpec((None, C_tile, 1), lambda s, c, b, h: (s, c, 0)),
                pl.BlockSpec((None, C_tile, 1), lambda s, c, b, h: (s, c, 0)),
            ],
        ),
        compiler_params=pltpu.CompilerParams(
            dimension_semantics=("parallel", "parallel", "arbitrary", "arbitrary"),
            vmem_limit_bytes=vmem1),
        cost_estimate=pl.CostEstimate(
            flops=3 * B * C * HW, transcendentals=0,
            bytes_accessed=B * C * HW * itemsize),
    )(x3, c0)

    # --- tiny pure-JAX combine: fold mean/var/gamma/beta into one bias ---
    s1 = jnp.sum(psum, axis=0) / N                 # (C, 1) = E[x - c0]
    s2 = jnp.sum(psq, axis=0) / N                  # (C, 1) = E[(x - c0)^2]
    mean = c0 + s1
    var = jnp.maximum(s2 - s1 * s1, 0.0)
    shift = mean * jax.lax.rsqrt(var + eps)        # reference precedence quirk
    g2d = g.reshape(C, 1)
    bias = bta.reshape(C, 1) - g2d * shift         # (C, 1) f32

    # --- pass 2: elementwise normalize, fully parallel (megacore-shardable) ---
    x_block_bytes2 = C_tile * HW_t2 * itemsize
    vmem2 = int(4 * x_block_bytes2 + 8 * C_tile * HW_t2) + (8 << 20)
    out3 = pl.pallas_call(
        _norm_kernel,
        out_shape=jax.ShapeDtypeStruct((B, C, HW), x.dtype),
        grid_spec=pltpu.PrefetchScalarGridSpec(
            num_scalar_prefetch=0,
            grid=(c_tiles, B, hw_tiles2),   # c slowest: gamma/bias DMA'd c_tiles times
            in_specs=[
                pl.BlockSpec((None, C_tile, HW_t2), lambda c, b, h: (b, c, h)),
                pl.BlockSpec((C_tile, 1), lambda c, b, h: (c, 0)),
                pl.BlockSpec((C_tile, 1), lambda c, b, h: (c, 0)),
            ],
            out_specs=pl.BlockSpec((None, C_tile, HW_t2),
                                   lambda c, b, h: (b, c, h)),
        ),
        compiler_params=pltpu.CompilerParams(
            dimension_semantics=("parallel", "parallel", "parallel"),
            vmem_limit_bytes=vmem2),
        cost_estimate=pl.CostEstimate(
            flops=2 * B * C * HW, transcendentals=0,
            bytes_accessed=2 * B * C * HW * itemsize),
    )(x3, g2d, bias)

    return out3.reshape(orig_shape)


# --------------------------------------------------------------------------
# Pure-JAX reference (matches the PyTorch module, incl. precedence quirk)
# --------------------------------------------------------------------------
def batchnorm_ref(x, gamma, beta, eps=1e-5, affine=True):
    B, C = x.shape[0], x.shape[1]
    orig = x.shape
    x3 = x.reshape(B, C, -1).astype(jnp.float32)
    mean = jnp.mean(x3, axis=(0, 2), keepdims=True)
    var = jnp.mean((x3 - mean) ** 2, axis=(0, 2), keepdims=True)
    xn = x3 - mean / jnp.sqrt(var + eps)
    if affine:
        xn = gamma.reshape(1, C, 1) * xn + beta.reshape(1, C, 1)
    return xn.reshape(orig).astype(x.dtype)


if __name__ == "__main__":
    key = jax.random.PRNGKey(0)
    k1, k2, k3, k4 = jax.random.split(key, 4)

    # Case 1: module-default parameters, small NCHW input (fused VMEM path).
    B, C, H, W = 2, 4, 16, 16
    x = jax.random.normal(k1, (B, C, H, W), dtype=jnp.float32)
    gamma = jnp.ones((C,), jnp.float32)    # nn.Parameter(torch.ones(channels))
    beta = jnp.zeros((C,), jnp.float32)    # nn.Parameter(torch.zeros(channels))
    out = jax.block_until_ready(batchnorm_pallas(x, gamma, beta, eps=1e-5, affine=True))
    ref = batchnorm_ref(x, gamma, beta, eps=1e-5, affine=True)
    assert out.shape == x.shape and out.dtype == x.dtype
    assert jnp.allclose(out, ref, atol=1e-5, rtol=1e-5), \
        float(jnp.max(jnp.abs(out - ref)))

    # Case 2: force the tiled two-pass path (multi-tile spatial axis including
    # a ragged last 128-lane tile, megacore split, non-trivial affine params).
    B2, C2, H2, W2 = 2, 4, 18, 18            # HW = 324 -> ragged 128-lane tiles
    x2 = jax.random.normal(k2, (B2, C2, H2, W2), dtype=jnp.float32) + 0.5
    gamma2 = 1.0 + 0.1 * jax.random.normal(k3, (C2,), dtype=jnp.float32)
    beta2 = 0.1 * jax.random.normal(k4, (C2,), dtype=jnp.float32)
    out2 = jax.block_until_ready(
        batchnorm_pallas(x2, gamma2, beta2, eps=1e-5, affine=True,
                         force_two_pass=True,
                         p1_block_elems=4 * 128, p2_block_elems=4 * 128))
    ref2 = batchnorm_ref(x2, gamma2, beta2, eps=1e-5, affine=True)
    assert out2.shape == x2.shape and out2.dtype == x2.dtype
    assert jnp.allclose(out2, ref2, atol=1e-5, rtol=1e-5), \
        float(jnp.max(jnp.abs(out2 - ref2)))

    print("KERNEL_OK")
</pallas_src>

<mosaic_0001>
module attributes {stable_mosaic.version = 11 : i64} {
  func.func @kernel(%arg0: i32, %arg1: memref<2x4x256xf32, #tpu.memory_space<vmem>>, %arg2: memref<1x4x1xf32, #tpu.memory_space<vmem>>, %arg3: memref<1x4x1xf32, #tpu.memory_space<vmem>>, %arg4: memref<2x4x256xf32, #tpu.memory_space<vmem>>) attributes {dimension_semantics = [#tpu.dimension_semantics<arbitrary>], iteration_bounds = array<i64: 1>, scalar_prefetch = 0 : i64, scratch_operands = 0 : i64, tpu.core_type = #tpu.core_type<tc>, window_params = [{pipeline_mode = #tpu.pipeline_mode<synchronous>, transform_indices = @transform_0, window_bounds = array<i64: 2, 4, 256>}, {pipeline_mode = #tpu.pipeline_mode<synchronous>, transform_indices = @transform_1, window_bounds = array<i64: 1, 4, 1>}, {pipeline_mode = #tpu.pipeline_mode<synchronous>, transform_indices = @transform_2, window_bounds = array<i64: 1, 4, 1>}, {pipeline_mode = #tpu.pipeline_mode<synchronous>, transform_indices = @transform_3, window_bounds = array<i64: 2, 4, 256>}]} {
    %c0 = arith.constant 0 : index
    %c0_0 = arith.constant 0 : index
    %c0_1 = arith.constant 0 : index
    %0 = vector.load %arg1[%c0, %c0_0, %c0_1] : memref<2x4x256xf32, #tpu.memory_space<vmem>>, vector<2x4x256xf32>
    %cst = arith.constant dense<0.000000e+00> : vector<2x4xf32>
    %1 = vector.multi_reduction <add>, %0, %cst [2] : vector<2x4x256xf32> to vector<2x4xf32>
    %2 = vector.shape_cast %1 : vector<2x4xf32> to vector<2x4x1xf32>
    %cst_2 = arith.constant dense<0.000000e+00> : vector<4x1xf32>
    %3 = vector.multi_reduction <add>, %2, %cst_2 [0] : vector<2x4x1xf32> to vector<4x1xf32>
    %4 = vector.shape_cast %3 : vector<4x1xf32> to vector<1x4x1xf32>
    %cst_3 = arith.constant 0.001953125 : f32
    %5 = vector.broadcast %cst_3 : f32 to vector<1x4x1xf32>
    %6 = arith.mulf %4, %5 : vector<1x4x1xf32>
    %7 = vector.broadcast %6 : vector<1x4x1xf32> to vector<2x4x256xf32>
    %8 = arith.subf %0, %7 : vector<2x4x256xf32>
    %9 = arith.mulf %8, %8 : vector<2x4x256xf32>
    %cst_4 = arith.constant dense<0.000000e+00> : vector<2x4xf32>
    %10 = vector.multi_reduction <add>, %9, %cst_4 [2] : vector<2x4x256xf32> to vector<2x4xf32>
    %11 = vector.shape_cast %10 : vector<2x4xf32> to vector<2x4x1xf32>
    %cst_5 = arith.constant dense<0.000000e+00> : vector<4x1xf32>
    %12 = vector.multi_reduction <add>, %11, %cst_5 [0] : vector<2x4x1xf32> to vector<4x1xf32>
    %13 = vector.shape_cast %12 : vector<4x1xf32> to vector<1x4x1xf32>
    %cst_6 = arith.constant 0.001953125 : f32
    %14 = vector.broadcast %cst_6 : f32 to vector<1x4x1xf32>
    %15 = arith.mulf %13, %14 : vector<1x4x1xf32>
    %cst_7 = arith.constant 9.99999974E-6 : f32
    %16 = vector.broadcast %cst_7 : f32 to vector<1x4x1xf32>
    %17 = arith.addf %15, %16 : vector<1x4x1xf32>
    %18 = math.rsqrt %17 : vector<1x4x1xf32>
    %19 = arith.mulf %6, %18 : vector<1x4x1xf32>
    %c0_8 = arith.constant 0 : index
    %c0_9 = arith.constant 0 : index
    %c0_10 = arith.constant 0 : index
    %20 = vector.load %arg2[%c0_8, %c0_9, %c0_10] : memref<1x4x1xf32, #tpu.memory_space<vmem>>, vector<1x4x1xf32>
    %21 = vector.broadcast %19 : vector<1x4x1xf32> to vector<2x4x256xf32>
    %22 = arith.subf %0, %21 : vector<2x4x256xf32>
    %23 = vector.broadcast %20 : vector<1x4x1xf32> to vector<2x4x256xf32>
    %24 = arith.mulf %23, %22 : vector<2x4x256xf32>
    %c0_11 = arith.constant 0 : index
    %c0_12 = arith.constant 0 : index
    %c0_13 = arith.constant 0 : index
    %25 = vector.load %arg3[%c0_11, %c0_12, %c0_13] : memref<1x4x1xf32, #tpu.memory_space<vmem>>, vector<1x4x1xf32>
    %26 = vector.broadcast %25 : vector<1x4x1xf32> to vector<2x4x256xf32>
    %27 = arith.addf %24, %26 : vector<2x4x256xf32>
    %c0_14 = arith.constant 0 : index
    %c0_15 = arith.constant 0 : index
    %c0_16 = arith.constant 0 : index
    %28 = vector.load %arg4[%c0_14, %c0_15, %c0_16] : memref<2x4x256xf32, #tpu.memory_space<vmem>>, vector<2x4x256xf32>
    tpu.vector_store %arg4[%c0_14, %c0_15, %c0_16], %27 {strides = array<i32>} : memref<2x4x256xf32, #tpu.memory_space<vmem>>, vector<2x4x256xf32>,
    return
  }
  func.func @transform_0(%arg0: i32) -> (i32, i32, i32) {
    %c0_i32 = arith.constant 0 : i32
    %c0_i32_0 = arith.constant 0 : i32
    %c0_i32_1 = arith.constant 0 : i32
    %c0_i32_2 = arith.constant 0 : i32
    return %c0_i32, %c0_i32_0, %c0_i32_1 : i32, i32, i32
  }
  func.func @transform_1(%arg0: i32) -> (i32, i32, i32) {
    %c0_i32 = arith.constant 0 : i32
    %c0_i32_0 = arith.constant 0 : i32
    %c0_i32_1 = arith.constant 0 : i32
    %c0_i32_2 = arith.constant 0 : i32
    return %c0_i32, %c0_i32_0, %c0_i32_1 : i32, i32, i32
  }
  func.func @transform_2(%arg0: i32) -> (i32, i32, i32) {
    %c0_i32 = arith.constant 0 : i32
    %c0_i32_0 = arith.constant 0 : i32
    %c0_i32_1 = arith.constant 0 : i32
    %c0_i32_2 = arith.constant 0 : i32
    return %c0_i32, %c0_i32_0, %c0_i32_1 : i32, i32, i32
  }
  func.func @transform_3(%arg0: i32) -> (i32, i32, i32) {
    %c0_i32 = arith.constant 0 : i32
    %c0_i32_0 = arith.constant 0 : i32
    %c0_i32_1 = arith.constant 0 : i32
    %c0_i32_2 = arith.constant 0 : i32
    return %c0_i32, %c0_i32_0, %c0_i32_1 : i32, i32, i32
  }
}

</mosaic_0001>

<bundles_post_ra>
// kernel: tpu_custom_call.1
= control target key start
LH: loop header
LB: loop body
LE: loop exit
PB: predicated region body
PF: predicated region fallthrough
CT: control target
= control target key end

     0   :  { %8 = vsyncpa [#allocation3], 0  ;;  %s286_s0 = inlined_call_operand.hbm [shape: f32[2,4,256], index: 0, kind: input, shape index: {}]   ;;  %s287_s1 = inlined_call_operand.vmem [shape: f32[1,4,1], index: 1, kind: input, shape index: {}]   ;;  %s288_s2 = inlined_call_operand.vmem [shape: f32[1,4,1], index: 2, kind: input, shape index: {}]   ;;  %s289_s3 = inlined_call_operand.hbm [shape: f32[2,4,256], index: 3, kind: output, shape index: {}]  }
   0x1   :  { %9 = vsyncpa [#allocation4], 0  ;;  %s212_s12 = smov [#allocation2]   ;;  %s164_s16 = scalar_lea.hbm %s286_s0, 256 }
   0x2   :  { %s15_s13 = sshll.u32 %s212_s12, 4  ;;  %p165_p0 = scmp.ne.s32.totalorder %s286_s0, %s164_s16  ;;  %s16_s13 = int_to_ptr.vmem [resolvable:$true] %s15_s13 }
   0x3   :  { %p168_p1 = scmp.lt.u32.totalorder %s164_s16, %s286_s0 }
   0x5   :  { %p170_p2 = pnand %p168_p1, %p165_p0 }
   0x7   :  { %173 = shalt.err (!%p170_p2)
}
   0x8   :  { %s174_s21 = scalar_lea.vmem %s16_s13, 256  ;;  %p179_p4 = scmp.lt.s32.totalorder %s16_s13, %s16_s13 }
   0x9   :  { %p175_p3 = scmp.ne.s32.totalorder %s16_s13, %s174_s21  ;;  %p180_p5 = scmp.lt.s32.totalorder %s174_s21, %s174_s21 }
   0xb   :  { %p181_p6 = por %p180_p5, %p179_p4 }
   0xd   :  { %p182_p7 = pnand %p181_p6, %p175_p3 }
   0xf   :  { %185 = shalt.err (!%p182_p7)
}
  0x10   :  { %s213_s22 = smov 128   ;;  %s214_s23 = smov 8  }
  0x11   :  { %21 = dma.hbm_to_vmem [thread:$0]  %s286_s0, 256, %s16_s13, [#allocation3], %s213_s22, %s213_s22, %s214_s23  }
  0x12   :  { %208 = dma.done.wait [#allocation3], 256  }
  0x13   :  { %209 = vsyncadd [#allocation3], 4294967040  ;;  %vm37_vm0 = vcmask 1043456   ;;  %v29_v0 = vld [vmem:[#allocation2] sm:$0xff]  ;;  %v30_v1 = vld [vmem:[#allocation2 + $0x8] sm:$0xff]  ;;  %v215_v11 = vmov 0   ;;  %v56_v14 = vlaneseq }
  0x14   :  { %v33_v2 = vcombine.high %v29_v0, %v29_v0  ;;  %v38_v3 = vsel %vm37_vm0, %v29_v0, 0.0  ;;  %v34_v4 = vcombine.high %v30_v1, %v30_v1  ;;  %v43_v6 = vsel %vm37_vm0, %v30_v1, 0.0  ;;  %v88_v10 = vld [vmem:[%s287_s1] sm:$0xf]  ;;  %158 = vset.pattern.permute.xlu0 %v215_v11  ;;  %159 = vset.pattern.permute.xlu1 %v215_v11 }
  0x15   :  { %v216_v12 = vmov 839922192   ;;  %v57_v17 = vshrl.u32 %v56_v14, 7  ;;  %v115_v37 = vld [vmem:[%s288_s2] sm:$0xf]  ;;  %s217_s2 = smov [#allocation5]  }
  0x16   :  { %v39_v5 = vsel %vm37_vm0, %v33_v2, 0.0  ;;  %v44_v7 = vsel %vm37_vm0, %v34_v4, 0.0  ;;  %v54_v13 = vunpack.c.l.s4 %v216_v12  ;;  %s140_s28 = sshll.u32 %s217_s2, 4  ;;  %s141_s28 = int_to_ptr.vmem [resolvable:$true] %s140_s28 }
  0x17   :  { %v40_v8 = vadd.f32 %v39_v5, %v38_v3  ;;  %v45_v9 = vadd.f32 %v44_v7, %v43_v6  ;;  %s186_s29 = scalar_lea.vmem %s141_s28, 256  ;;  %p191_p9 = scmp.lt.s32.totalorder %s141_s28, %s141_s28 }
  0x18   :  { %v55_v16 = vunpack.c.0.s8 %v54_v13  ;;  %p187_p8 = scmp.ne.s32.totalorder %s141_s28, %s186_s29  ;;  %p192_p10 = scmp.lt.s32.totalorder %s186_s29, %s186_s29 }
  0x19   :  { %41 = vadd.xlane.f32.xlu0 %v40_v8 }
  0x1a   :  { %v58_v21 = vsub.s32 %v55_v16, %v57_v17  ;;  %p193_p11 = por %p192_p10, %p191_p9 }
  0x1c   :  { %p194_p12 = pnand %p193_p11, %p187_p8 }
  0x1d   :  { %46 = vadd.xlane.f32.xlu0 %v45_v9 }
  0x33   :  { %102 = vperm.xlu0 %158, %v88_v10  }
  0xa6   :  { %v42_v15 = vpop.xlane.xlu0 %41 }
  0xa7   :  { %v48_v19 = vsel %vm37_vm0, %v42_v15, 0.0 }
  0xaa   :  { %v47_v18 = vpop.xlane.xlu0 %46 }
  0xab   :  { %v49_v20 = vsel %vm37_vm0, %v47_v18, 0.0 }
  0xac   :  { %v50_v22 = vadd.f32 %v49_v20, %v48_v19 }
  0xae   :  { %v51_v23 = vmul.f32 0.001953125, %v50_v22 }
  0xb0   :  { %v59_v24 = vrot.slane %v51_v23, %v58_v21 }
  0xb2   :  { %v61_v25 = vsub.f32 %v29_v0, %v59_v24  ;;  %v62_v26 = vsub.f32 %v30_v1, %v59_v24  ;;  %v103_v48 = vpop.permute.xlu0 %102 }
  0xb4   :  { %v63_v27 = vmul.f32 %v61_v25, %v61_v25  ;;  %v64_v28 = vmul.f32 %v62_v26, %v62_v26 }
  0xb6   :  { %v67_v29 = vcombine.high %v63_v27, %v63_v27  ;;  %v68_v30 = vcombine.high %v64_v28, %v64_v28  ;;  %v71_v31 = vsel %vm37_vm0, %v63_v27, 0.0  ;;  %v76_v35 = vsel %vm37_vm0, %v64_v28, 0.0 }
  0xb8   :  { %v72_v32 = vsel %vm37_vm0, %v67_v29, 0.0  ;;  %v77_v34 = vsel %vm37_vm0, %v68_v30, 0.0 }
  0xb9   :  { %v73_v33 = vadd.f32 %v72_v32, %v71_v31  ;;  %v78_v36 = vadd.f32 %v77_v34, %v76_v35 }
  0xbb   :  { %74 = vadd.xlane.f32.xlu1 %v73_v33 }
  0xbf   :  { %79 = vadd.xlane.f32.xlu1 %v78_v36 }
  0xd0   :  { %118 = vperm.xlu1 %159, %v115_v37  }
 0x148   :  { %v75_v38 = vpop.xlane.xlu1 %74 }
 0x149   :  { %v81_v40 = vsel %vm37_vm0, %v75_v38, 0.0 }
 0x14c   :  { %v80_v39 = vpop.xlane.xlu1 %79 }
 0x14d   :  { %v82_v41 = vsel %vm37_vm0, %v80_v39, 0.0 }
 0x14e   :  { %v83_v42 = vadd.f32 %v82_v41, %v81_v40 }
 0x150   :  { %v84_v43 = vmul.f32 0.001953125, %v83_v42  ;;  %v119_v55 = vpop.permute.xlu1 %118 }
 0x152   :  { %v85_v44 = vadd.f32 1e-05, %v84_v43 }
 0x154   :  { %162 = vrsqrt.f32 %v85_v44 }
 0x15e   :  { %v163_v45 = vpop.eup %162 }
 0x15f   :  { %v87_v46 = vmul.f32 %v163_v45, %v51_v23 }
 0x161   :  { %v96_v47 = vrot.slane %v87_v46, %v58_v21 }
 0x163   :  { %v98_v49 = vsub.f32 %v29_v0, %v96_v47  ;;  %v99_v50 = vsub.f32 %v30_v1, %v96_v47 }
 0x165   :  { %v107_v51 = vcombine.high %v98_v49, %v98_v49  ;;  %v108_v52 = vcombine.high %v99_v50, %v99_v50  ;;  %v111_v53 = vmul.f32 %v103_v48, %v98_v49  ;;  %v113_v54 = vmul.f32 %v103_v48, %v99_v50 }
 0x167   :  { %v112_v56 = vmul.f32 %v107_v51, %v103_v48  ;;  %v114_v57 = vmul.f32 %v108_v52, %v103_v48  ;;  %v121_v58 = vadd.f32 %v119_v55, %v111_v53  ;;  %v123_v60 = vadd.f32 %v119_v55, %v113_v54 }
 0x169   :  { %v122_v59 = vadd.f32 %v119_v55, %v112_v56  ;;  %v124_v61 = vadd.f32 %v119_v55, %v114_v57 }
 0x16b   :  { %v129_v62 = vcombine.low %v121_v58, %v122_v59  ;;  %v130_v63 = vcombine.low %v123_v60, %v124_v61 }
 0x16d   :  { %133 = vst [vmem:[#allocation5] sm:$0xff] %v129_v62  ;;  %134 = vst [vmem:[#allocation5 + $0x8] sm:$0xff] %v130_v63 }
 0x16e   :  { %197 = shalt.err (!%p194_p12)
}
 0x16f   :  { %s198_s5 = scalar_lea.hbm %s289_s3, 256 }
 0x170   :  { %p199_p13 = scmp.ne.s32.totalorder %s289_s3, %s198_s5  ;;  %p202_p0 = scmp.lt.u32.totalorder %s198_s5, %s289_s3 }
 0x172   :  { %p204_p1 = pnand %p202_p0, %p199_p13 }
 0x174   :  { %207 = shalt.err (!%p204_p1)
}
 0x175   :  { %146 = dma.vmem_to_hbm [thread:$0]  %s141_s28, 256, %s289_s3, [#allocation4], %s213_s22, %s213_s22, %s214_s23  }
 0x176   :  { %210 = dma.done.wait [#allocation4], 256  }
 0x177   :  { %211 = vsyncadd [#allocation4], 4294967040 }
 0x178   :  { %150 = vsyncpa [#allocation3], 1 }
 0x179   :  { %151 = vsyncpa [#allocation4], 1 }

</bundles_post_ra>
